<compile_context>
chip_gen: v7x
topology: tpu7x:2x2x1
jax: 0.10.0
libtpu: 0.0.40
codegen_flags: <defaults>
</compile_context>

<pallas_src>
import jax
import jax.numpy as jnp
from jax import lax
from jax.experimental import pallas as pl
from jax.experimental.pallas import tpu as pltpu


def _round_up(x, m):
    return ((x + m - 1) // m) * m


# ---------------------- Fused kernel: MLP + global max pool ------------------
def _fused_mlp_pool_kernel(off_ref,                       # SMEM: [B+1] row offsets
                           x_ref, pos_ref,                # [TN, Cx], [TN, 3]
                           w1x_ref, w1p_ref, b1_ref,      # bf16/bf16/f32
                           w2_ref,                        # bf16 [H_pad, O_pad], BN folded
                           out_ref):                      # resident [B, O_pad] slab
    i = pl.program_id(1)
    tile_idx = pl.program_id(0) * pl.num_programs(1) + i
    tn = x_ref.shape[0]
    num_b = out_ref.shape[0]

    @pl.when(i == 0)
    def _init():
        out_ref[...] = jnp.full(out_ref.shape, -jnp.inf, dtype=out_ref.dtype)

    # --- per-point MLP on this row tile (bf16 MXU, f32 accumulation) ---
    h = (jnp.dot(x_ref[...].astype(jnp.bfloat16), w1x_ref[...],
                 preferred_element_type=jnp.float32)
         + jnp.dot(pos_ref[...].astype(jnp.bfloat16), w1p_ref[...],
                   preferred_element_type=jnp.float32)
         + b1_ref[...])
    h = jnp.maximum(h, 0.0)                                           # ReLU (BN1 folded into w2)
    z = jnp.dot(h.astype(jnp.bfloat16), w2_ref[...],
                preferred_element_type=jnp.float32)                   # [TN, O_pad]
    # layer-2 bias + BN2 sign/shift are applied post-pool in the wrapper
    # (they commute with the per-batch max).

    # --- fused global max pool over only the batches intersecting this tile ---
    row_lo = tile_idx * tn
    rows = row_lo + lax.broadcasted_iota(jnp.int32, (tn, 1), 0)       # global row ids
    b_iota = lax.broadcasted_iota(jnp.int32, (num_b, 1), 0)

    def _count(b, carry):                                             # scalar SMEM scan
        lo_cnt, hi_cnt = carry
        lo_cnt = lo_cnt + (off_ref[b + 1] <= row_lo).astype(jnp.int32)
        hi_cnt = hi_cnt + (off_ref[b] < row_lo + tn).astype(jnp.int32)
        return lo_cnt, hi_cnt

    b_lo, b_hi = lax.fori_loop(0, num_b, _count,
                               (jnp.int32(0), jnp.int32(0)))

    def _pool(b, carry):                                              # 1-2 iters typically
        lo = off_ref[b]
        hi = off_ref[b + 1]
        in_seg = (rows >= lo) & (rows < hi)                           # [TN, 1]; rows >= N never match
        seg_max = jnp.max(jnp.where(in_seg, z, -jnp.inf),
                          axis=0, keepdims=True)                      # [1, O_pad]
        cur = out_ref[...]
        out_ref[...] = jnp.where(b_iota == b, jnp.maximum(cur, seg_max), cur)
        return carry

    lax.fori_loop(b_lo, b_hi, _pool, jnp.int32(0))


# ----------------------------- Module wrapper --------------------------------
def global_sa_module(x, pos, batch, params, *, num_batches, tile_n=2048):
    """Pallas port of GlobalSAModule.forward(x, pos, batch) (BN in eval mode).

    params = (w1, b1, s1, t1, w2, b2, s2, t2) with s*/t* the folded BN scale/shift.
    nn is Seq(Lin, ReLU, BN, Lin, ReLU, BN).  `batch` must be sorted/contiguous.
    """
    w1, b1, s1, t1, w2, b2, s2, t2 = params
    N, Cx = x.shape
    Cp = pos.shape[1]
    H = w1.shape[1]
    O = w2.shape[1]

    b1 = b1.reshape(1, -1)
    b2 = b2.reshape(1, -1)
    s1 = s1.reshape(1, -1)
    t1 = t1.reshape(1, -1)
    s2 = s2.reshape(1, -1)
    t2 = t2.reshape(1, -1)

    # Fold BN1 and the BN2 scale into the second Linear (exact algebra):
    #   y_pre = relu(lin1) @ (s1*w2) + (t1@w2 + b2);  z = s2*y_pre = relu1 @ w2k + b2k
    #   final = s2*relu(y_pre) + t2 = [relu(z) if s2>=0 else min(z,0)] + t2
    # relu and min(.,0) are monotone, so they (and +b2k, +t2) commute with the
    # per-batch max and are applied post-pool.
    w2k = (s1.reshape(-1, 1) * w2) * s2                  # [H, O]
    b2k = (t1 @ w2 + b2) * s2                            # [1, O]  (post-pool)

    # Lane-pad H and O to multiples of 128; weights in bf16 (tiny, grid-invariant).
    H_pad = _round_up(H, 128)
    O_pad = _round_up(O, 128)
    w1x = jnp.zeros((Cx, H_pad), jnp.bfloat16).at[:, :H].set(w1[:Cx].astype(jnp.bfloat16))
    w1p = jnp.zeros((Cp, H_pad), jnp.bfloat16).at[:, :H].set(w1[Cx:].astype(jnp.bfloat16))
    b1p = jnp.zeros((1, H_pad), jnp.float32).at[:, :H].set(b1.astype(jnp.float32))
    w2kp = jnp.zeros((H_pad, O_pad), jnp.bfloat16).at[:H, :O].set(w2k.astype(jnp.bfloat16))

    # Row tiling: big tiles, ragged last tile handled by Pallas block padding.
    if tile_n >= N:
        tn = N                                  # single block == full row dim
    else:
        tn = max(8, _round_up(tile_n, 8))
        if tn >= N:
            tn = N
    n_tiles = -(-N // tn)
    # Two output slabs on a leading "parallel" axis -> both TensorCores on v7x.
    splits = 2 if (n_tiles >= 2 and n_tiles % 2 == 0) else 1
    n_inner = n_tiles // splits

    # Per-batch row offsets (scalar prefetch -> SMEM).  Rows >= N match no batch.
    offs = jnp.searchsorted(batch.astype(jnp.int32),
                            jnp.arange(num_batches + 1, dtype=jnp.int32),
                            side="left").astype(jnp.int32)

    slabs = pl.pallas_call(
        _fused_mlp_pool_kernel,
        out_shape=jax.ShapeDtypeStruct((splits, num_batches, O_pad), jnp.float32),
        grid_spec=pltpu.PrefetchScalarGridSpec(
            num_scalar_prefetch=1,
            grid=(splits, n_inner),
            in_specs=[
                pl.BlockSpec((tn, Cx), lambda c, i, off: (c * n_inner + i, 0)),
                pl.BlockSpec((tn, Cp), lambda c, i, off: (c * n_inner + i, 0)),
                pl.BlockSpec((Cx, H_pad), lambda c, i, off: (0, 0)),
                pl.BlockSpec((Cp, H_pad), lambda c, i, off: (0, 0)),
                pl.BlockSpec((1, H_pad), lambda c, i, off: (0, 0)),
                pl.BlockSpec((H_pad, O_pad), lambda c, i, off: (0, 0)),
            ],
            out_specs=pl.BlockSpec((None, num_batches, O_pad),
                                   lambda c, i, off: (c, 0, 0)),
        ),
        compiler_params=pltpu.CompilerParams(
            dimension_semantics=("parallel", "arbitrary"),
            vmem_limit_bytes=32 * 1024 * 1024,
        ),
    )(offs, x, pos, w1x, w1p, b1p, w2kp)

    pooled = jnp.max(slabs, axis=0)[:, :O]               # combine the per-core slabs
    mz = pooled + b2k                                     # layer-2 bias (post-pool)
    out = jnp.where(s2 >= 0.0, jnp.maximum(mz, 0.0), jnp.minimum(mz, 0.0)) + t2

    pos_out = jnp.zeros((num_batches, 3), dtype=pos.dtype)
    batch_out = jnp.arange(num_batches, dtype=batch.dtype)
    return out, pos_out, batch_out


def _fold_bn(gamma, beta, mean, var, eps=1e-5):
    scale = gamma / jnp.sqrt(var + eps)
    shift = beta - mean * scale
    return scale.reshape(1, -1), shift.reshape(1, -1)


if __name__ == "__main__":
    key = jax.random.PRNGKey(0)
    B = 2           # number of graphs in the batch
    P = 7           # points per graph (exercises the ragged-tile path)
    N = B * P       # total points
    Cx = 5          # point feature channels
    Cin = Cx + 3    # after cat with pos
    H = 32          # hidden width
    O = 64          # output width

    keys = jax.random.split(key, 12)
    x = jax.random.normal(keys[0], (N, Cx), dtype=jnp.float32)
    pos = jax.random.normal(keys[1], (N, 3), dtype=jnp.float32)
    batch = jnp.repeat(jnp.arange(B, dtype=jnp.int32), P)

    # Deterministic parameter init (Linear + BatchNorm1d eval stats).
    w1 = jax.random.normal(keys[2], (Cin, H), dtype=jnp.float32) * 0.2
    b1 = jax.random.normal(keys[3], (1, H), dtype=jnp.float32) * 0.1
    w2 = jax.random.normal(keys[4], (H, O), dtype=jnp.float32) * 0.2
    b2 = jax.random.normal(keys[5], (1, O), dtype=jnp.float32) * 0.1
    g1 = 1.0 + 0.1 * jax.random.normal(keys[6], (H,), dtype=jnp.float32)
    be1 = 0.1 * jax.random.normal(keys[7], (H,), dtype=jnp.float32)
    m1 = 0.1 * jax.random.normal(keys[8], (H,), dtype=jnp.float32)
    v1 = 1.0 + 0.1 * jnp.abs(jax.random.normal(keys[9], (H,), dtype=jnp.float32))
    # Mixed-sign BN2 gamma exercises the post-pool sign handling.
    g2 = jax.random.normal(keys[10], (O,), dtype=jnp.float32)
    be2 = 0.1 * jax.random.normal(keys[11], (O,), dtype=jnp.float32)
    m2 = 0.05 * jnp.ones((O,), jnp.float32)
    v2 = jnp.ones((O,), jnp.float32)

    s1, t1 = _fold_bn(g1, be1, m1, v1)
    s2, t2 = _fold_bn(g2, be2, m2, v2)
    params = (w1, b1, s1, t1, w2, b2, s2, t2)

    # Default (single large tile) path.
    out_x, out_pos, out_batch = global_sa_module(
        x, pos, batch, params, num_batches=B)
    jax.block_until_ready((out_x, out_pos, out_batch))

    # Multi-tile path: 2 tiles -> two-slab "parallel" split, ragged last tile,
    # tiles spanning more than one batch.
    out_x2, _, _ = global_sa_module(
        x, pos, batch, params, num_batches=B, tile_n=8)
    jax.block_until_ready(out_x2)

    # Pure-JAX reference (unfolded, unpadded f32 math).
    xc = jnp.concatenate([x, pos], axis=1)
    h = jnp.maximum(xc @ w1 + b1, 0.0) * s1 + t1
    y = jnp.maximum(h @ w2 + b2, 0.0) * s2 + t2
    ref = jnp.stack(
        [jnp.max(jnp.where((batch == b)[:, None], y, -jnp.inf), axis=0)
         for b in range(B)], axis=0)

    assert out_x.shape == (B, O)
    assert out_pos.shape == (B, 3) and bool(jnp.all(out_pos == 0.0))
    assert jnp.array_equal(out_batch, jnp.arange(B, dtype=jnp.int32))
    # bf16 matmuls -> loose-ish tolerance vs the f32 reference.
    assert jnp.allclose(out_x, ref, rtol=5e-2, atol=5e-2), float(jnp.max(jnp.abs(out_x - ref)))
    assert jnp.allclose(out_x2, ref, rtol=5e-2, atol=5e-2), float(jnp.max(jnp.abs(out_x2 - ref)))

    print("KERNEL_OK")
</pallas_src>

<mosaic_0001>
module attributes {stable_mosaic.version = 11 : i64} {
  func.func @_fused_mlp_pool_kernel(%arg0: i32, %arg1: i32, %arg2: memref<3xi32, #tpu.memory_space<smem>>, %arg3: memref<14x5xf32, #tpu.memory_space<vmem>>, %arg4: memref<14x3xf32, #tpu.memory_space<vmem>>, %arg5: memref<5x128xbf16, #tpu.memory_space<vmem>>, %arg6: memref<3x128xbf16, #tpu.memory_space<vmem>>, %arg7: memref<1x128xf32, #tpu.memory_space<vmem>>, %arg8: memref<128x128xbf16, #tpu.memory_space<vmem>>, %arg9: memref<1x2x128xf32, #tpu.memory_space<vmem>>) attributes {dimension_semantics = [#tpu.dimension_semantics<parallel>, #tpu.dimension_semantics<arbitrary>], iteration_bounds = array<i64: 1, 1>, scalar_prefetch = 1 : i64, scratch_operands = 0 : i64, tpu.core_type = #tpu.core_type<tc>, window_params = [{transform_indices = @transform_0, window_bounds = array<i64: 14, 5>}, {transform_indices = @transform_1, window_bounds = array<i64: 14, 3>}, {pipeline_mode = #tpu.pipeline_mode<synchronous>, transform_indices = @transform_2, window_bounds = array<i64: 5, 128>}, {pipeline_mode = #tpu.pipeline_mode<synchronous>, transform_indices = @transform_3, window_bounds = array<i64: 3, 128>}, {pipeline_mode = #tpu.pipeline_mode<synchronous>, transform_indices = @transform_4, window_bounds = array<i64: 1, 128>}, {pipeline_mode = #tpu.pipeline_mode<synchronous>, transform_indices = @transform_5, window_bounds = array<i64: 128, 128>}, {transform_indices = @transform_6, window_bounds = array<i64: 1, 2, 128>}]} {
    %c1_i32 = arith.constant 1 : i32
    %0 = arith.muli %arg0, %c1_i32 : i32
    %1 = arith.addi %0, %arg1 : i32
    %c0_i32 = arith.constant 0 : i32
    %2 = arith.cmpi eq, %arg1, %c0_i32 : i32
    %3 = arith.extui %2 : i1 to i32
    %c0_i32_0 = arith.constant 0 : i32
    %4 = arith.cmpi ne, %3, %c0_i32_0 : i32
    scf.if %4 {
      %cst_22 = arith.constant 0xFF800000 : f32
      %31 = vector.broadcast %cst_22 : f32 to vector<2x128xf32>
      %c0_23 = arith.constant 0 : index
      %c0_24 = arith.constant 0 : index
      %c0_25 = arith.constant 0 : index
      %32 = vector.load %arg9[%c0_23, %c0_24, %c0_25] : memref<1x2x128xf32, #tpu.memory_space<vmem>>, vector<1x2x128xf32>
      %33 = vector.shape_cast %32 : vector<1x2x128xf32> to vector<2x128xf32>
      %34 = vector.shape_cast %31 : vector<2x128xf32> to vector<1x2x128xf32>
      tpu.vector_store %arg9[%c0_23, %c0_24, %c0_25], %34 {strides = array<i32>} : memref<1x2x128xf32, #tpu.memory_space<vmem>>, vector<1x2x128xf32>,
    } else {
    }
    %c0 = arith.constant 0 : index
    %c0_1 = arith.constant 0 : index
    %5 = vector.load %arg3[%c0, %c0_1] : memref<14x5xf32, #tpu.memory_space<vmem>>, vector<14x5xf32>
    %6 = arith.truncf %5 : vector<14x5xf32> to vector<14x5xbf16>
    %c0_2 = arith.constant 0 : index
    %c0_3 = arith.constant 0 : index
    %7 = vector.load %arg5[%c0_2, %c0_3] : memref<5x128xbf16, #tpu.memory_space<vmem>>, vector<5x128xbf16>
    %cst = arith.constant dense<0.000000e+00> : vector<14x128xf32>
    %8 = tpu.matmul %6, %7, %cst {dimension_numbers = #tpu.dot_dimension_numbers<[1], [0], [0], [1], [0, 0, 1, 1], [], []>} : vector<14x5xbf16>, vector<5x128xbf16>, vector<14x128xf32> -> vector<14x128xf32>
    %c0_4 = arith.constant 0 : index
    %c0_5 = arith.constant 0 : index
    %9 = vector.load %arg4[%c0_4, %c0_5] : memref<14x3xf32, #tpu.memory_space<vmem>>, vector<14x3xf32>
    %10 = arith.truncf %9 : vector<14x3xf32> to vector<14x3xbf16>
    %c0_6 = arith.constant 0 : index
    %c0_7 = arith.constant 0 : index
    %11 = vector.load %arg6[%c0_6, %c0_7] : memref<3x128xbf16, #tpu.memory_space<vmem>>, vector<3x128xbf16>
    %cst_8 = arith.constant dense<0.000000e+00> : vector<14x128xf32>
    %12 = tpu.matmul %10, %11, %cst_8 {dimension_numbers = #tpu.dot_dimension_numbers<[1], [0], [0], [1], [0, 0, 1, 1], [], []>} : vector<14x3xbf16>, vector<3x128xbf16>, vector<14x128xf32> -> vector<14x128xf32>
    %13 = arith.addf %8, %12 : vector<14x128xf32>
    %c0_9 = arith.constant 0 : index
    %c0_10 = arith.constant 0 : index
    %14 = vector.load %arg7[%c0_9, %c0_10] : memref<1x128xf32, #tpu.memory_space<vmem>>, vector<1x128xf32>
    %15 = vector.broadcast %14 : vector<1x128xf32> to vector<14x128xf32>
    %16 = arith.addf %13, %15 : vector<14x128xf32>
    %cst_11 = arith.constant 0.000000e+00 : f32
    %17 = vector.broadcast %cst_11 : f32 to vector<14x128xf32>
    %18 = arith.maximumf %16, %17 : vector<14x128xf32>
    %19 = arith.truncf %18 : vector<14x128xf32> to vector<14x128xbf16>
    %c0_12 = arith.constant 0 : index
    %c0_13 = arith.constant 0 : index
    %20 = vector.load %arg8[%c0_12, %c0_13] : memref<128x128xbf16, #tpu.memory_space<vmem>>, vector<128x128xbf16>
    %cst_14 = arith.constant dense<0.000000e+00> : vector<14x128xf32>
    %21 = tpu.matmul %19, %20, %cst_14 {dimension_numbers = #tpu.dot_dimension_numbers<[1], [0], [0], [1], [0, 0, 1, 1], [], []>} : vector<14x128xbf16>, vector<128x128xbf16>, vector<14x128xf32> -> vector<14x128xf32>
    %c14_i32 = arith.constant 14 : i32
    %22 = arith.muli %1, %c14_i32 : i32
    %23 = tpu.iota {dimensions = array<i32: 0>} : vector<14x1xi32>
    %24 = vector.broadcast %22 : i32 to vector<14x1xi32>
    %25 = arith.addi %24, %23 : vector<14x1xi32>
    %26 = tpu.iota {dimensions = array<i32: 0>} : vector<2x1xi32>
    %c0_i32_15 = arith.constant 0 : i32
    %c0_i32_16 = arith.constant 0 : i32
    %c0_i32_17 = arith.constant 0 : i32
    %c2_i32 = arith.constant 2 : i32
    %27 = arith.addi %c0_i32_17, %c2_i32 : i32
    %c1_i32_18 = arith.constant 1 : i32
    %28:2 = scf.for %arg10 = %c0_i32_17 to %27 step %c1_i32_18 iter_args(%arg11 = %c0_i32_15, %arg12 = %c0_i32_16) -> (i32, i32)  : i32 {
      %c1_i32_22 = arith.constant 1 : i32
      %31 = arith.addi %arg10, %c1_i32_22 : i32
      %32 = arith.index_cast %31 : i32 to index
      %33 = memref.load %arg2[%32] : memref<3xi32, #tpu.memory_space<smem>>
      %34 = arith.cmpi sle, %33, %22 : i32
      %35 = arith.extui %34 : i1 to i32
      %36 = arith.addi %arg11, %35 : i32
      %37 = arith.index_cast %arg10 : i32 to index
      %38 = memref.load %arg2[%37] : memref<3xi32, #tpu.memory_space<smem>>
      %c14_i32_23 = arith.constant 14 : i32
      %39 = arith.addi %22, %c14_i32_23 : i32
      %40 = arith.cmpi slt, %38, %39 : i32
      %41 = arith.extui %40 : i1 to i32
      %42 = arith.addi %arg12, %41 : i32
      scf.yield %36, %42 : i32, i32
    }
    %c2_i32_19 = arith.constant 2 : i32
    %c0_i32_20 = arith.constant 0 : i32
    %29 = arith.subi %28#1, %28#0 : i32
    %30 = arith.addi %28#0, %29 : i32
    %c1_i32_21 = arith.constant 1 : i32
    scf.for %arg10 = %28#0 to %30 step %c1_i32_21  : i32 {
      %31 = arith.index_cast %arg10 : i32 to index
      %32 = memref.load %arg2[%31] : memref<3xi32, #tpu.memory_space<smem>>
      %c1_i32_22 = arith.constant 1 : i32
      %33 = arith.addi %arg10, %c1_i32_22 : i32
      %34 = arith.index_cast %33 : i32 to index
      %35 = memref.load %arg2[%34] : memref<3xi32, #tpu.memory_space<smem>>
      %36 = vector.broadcast %32 : i32 to vector<14x1xi32>
      %37 = arith.cmpi sge, %25, %36 : vector<14x1xi32>
      %38 = vector.broadcast %35 : i32 to vector<14x1xi32>
      %39 = arith.cmpi slt, %25, %38 : vector<14x1xi32>
      %40 = arith.andi %37, %39 : vector<14x1xi1>
      %cst_23 = arith.constant 0xFF800000 : f32
      %41 = vector.shape_cast %40 : vector<14x1xi1> to vector<14x1xi1>
      %42 = vector.broadcast %41 : vector<14x1xi1> to vector<14x128xi1>
      %43 = vector.broadcast %cst_23 : f32 to vector<14x128xf32>
      %44 = arith.select %42, %21, %43 : vector<14x128xi1>, vector<14x128xf32>
      %cst_24 = arith.constant dense<0xFF800000> : vector<128xf32>
      %45 = vector.multi_reduction <maximumf>, %44, %cst_24 [0] : vector<14x128xf32> to vector<128xf32>
      %46 = vector.shape_cast %45 : vector<128xf32> to vector<1x128xf32>
      %c0_25 = arith.constant 0 : index
      %c0_26 = arith.constant 0 : index
      %c0_27 = arith.constant 0 : index
      %47 = vector.load %arg9[%c0_25, %c0_26, %c0_27] : memref<1x2x128xf32, #tpu.memory_space<vmem>>, vector<1x2x128xf32>
      %48 = vector.shape_cast %47 : vector<1x2x128xf32> to vector<2x128xf32>
      %49 = vector.broadcast %arg10 : i32 to vector<2x1xi32>
      %50 = arith.cmpi eq, %26, %49 : vector<2x1xi32>
      %51 = vector.broadcast %46 : vector<1x128xf32> to vector<2x128xf32>
      %52 = arith.maximumf %48, %51 : vector<2x128xf32>
      %53 = vector.shape_cast %50 : vector<2x1xi1> to vector<2x1xi1>
      %54 = vector.broadcast %53 : vector<2x1xi1> to vector<2x128xi1>
      %55 = arith.select %54, %52, %48 : vector<2x128xi1>, vector<2x128xf32>
      %c0_28 = arith.constant 0 : index
      %c0_29 = arith.constant 0 : index
      %c0_30 = arith.constant 0 : index
      %56 = vector.load %arg9[%c0_28, %c0_29, %c0_30] : memref<1x2x128xf32, #tpu.memory_space<vmem>>, vector<1x2x128xf32>
      %57 = vector.shape_cast %56 : vector<1x2x128xf32> to vector<2x128xf32>
      %58 = vector.shape_cast %55 : vector<2x128xf32> to vector<1x2x128xf32>
      tpu.vector_store %arg9[%c0_28, %c0_29, %c0_30], %58 {strides = array<i32>} : memref<1x2x128xf32, #tpu.memory_space<vmem>>, vector<1x2x128xf32>,
    }
    return
  }
  func.func @transform_0(%arg0: i32, %arg1: i32, %arg2: memref<3xi32, #tpu.memory_space<smem>>) -> (i32, i32) {
    %c1_i32 = arith.constant 1 : i32
    %0 = arith.muli %arg0, %c1_i32 : i32
    %1 = arith.addi %0, %arg1 : i32
    %c0_i32 = arith.constant 0 : i32
    %c0_i32_0 = arith.constant 0 : i32
    return %1, %c0_i32 : i32, i32
  }
  func.func @transform_1(%arg0: i32, %arg1: i32, %arg2: memref<3xi32, #tpu.memory_space<smem>>) -> (i32, i32) {
    %c1_i32 = arith.constant 1 : i32
    %0 = arith.muli %arg0, %c1_i32 : i32
    %1 = arith.addi %0, %arg1 : i32
    %c0_i32 = arith.constant 0 : i32
    %c0_i32_0 = arith.constant 0 : i32
    return %1, %c0_i32 : i32, i32
  }
  func.func @transform_2(%arg0: i32, %arg1: i32, %arg2: memref<3xi32, #tpu.memory_space<smem>>) -> (i32, i32) {
    %c0_i32 = arith.constant 0 : i32
    %c0_i32_0 = arith.constant 0 : i32
    %c0_i32_1 = arith.constant 0 : i32
    return %c0_i32, %c0_i32_0 : i32, i32
  }
  func.func @transform_3(%arg0: i32, %arg1: i32, %arg2: memref<3xi32, #tpu.memory_space<smem>>) -> (i32, i32) {
    %c0_i32 = arith.constant 0 : i32
    %c0_i32_0 = arith.constant 0 : i32
    %c0_i32_1 = arith.constant 0 : i32
    return %c0_i32, %c0_i32_0 : i32, i32
  }
  func.func @transform_4(%arg0: i32, %arg1: i32, %arg2: memref<3xi32, #tpu.memory_space<smem>>) -> (i32, i32) {
    %c0_i32 = arith.constant 0 : i32
    %c0_i32_0 = arith.constant 0 : i32
    %c0_i32_1 = arith.constant 0 : i32
    return %c0_i32, %c0_i32_0 : i32, i32
  }
  func.func @transform_5(%arg0: i32, %arg1: i32, %arg2: memref<3xi32, #tpu.memory_space<smem>>) -> (i32, i32) {
    %c0_i32 = arith.constant 0 : i32
    %c0_i32_0 = arith.constant 0 : i32
    %c0_i32_1 = arith.constant 0 : i32
    return %c0_i32, %c0_i32_0 : i32, i32
  }
  func.func @transform_6(%arg0: i32, %arg1: i32, %arg2: memref<3xi32, #tpu.memory_space<smem>>) -> (i32, i32, i32) {
    %c0_i32 = arith.constant 0 : i32
    %c0_i32_0 = arith.constant 0 : i32
    %c0_i32_1 = arith.constant 0 : i32
    return %arg0, %c0_i32, %c0_i32_0 : i32, i32, i32
  }
}

</mosaic_0001>

<bundles_post_ra>
// kernel: tpu_custom_call.1
= control target key start
LH: loop header
LB: loop body
LE: loop exit
PB: predicated region body
PF: predicated region fallthrough
CT: control target
= control target key end

     0   :  { %s819_s0 = inlined_call_operand.hbm [shape: s32[3], index: 0, kind: input, shape index: {}]   ;;  %s820_s1 = inlined_call_operand.vmem [shape: f32[14,5], index: 1, kind: input, shape index: {}]   ;;  %s821_s2 = inlined_call_operand.vmem [shape: f32[14,3], index: 2, kind: input, shape index: {}]   ;;  %s822_s3 = inlined_call_operand.hbm [shape: bf16[5,128], index: 3, kind: input, shape index: {}]   ;;  %s823_s4 = inlined_call_operand.vmem [shape: bf16[3,128], index: 4, kind: input, shape index: {}]   ;;  %s824_s5 = inlined_call_operand.hbm [shape: f32[1,128], index: 5, kind: input, shape index: {}]   ;;  %s825_s6 = inlined_call_operand.vmem [shape: bf16[128,128], index: 6, kind: input, shape index: {}]   ;;  %s826_s7 = inlined_call_operand.hbm [shape: f32[1,2,128], index: 7, kind: output, shape index: {}]  }
   0x1   :  { %s545_s26 = scalar_lea.hbm %s819_s0, 16 }
   0x2   :  { %p546_p0 = scmp.ne.s32.totalorder %s819_s0, %s545_s26  ;;  %p549_p1 = scmp.lt.u32.totalorder %s545_s26, %s819_s0 }
   0x4   :  { %p551_p2 = pnand %p549_p1, %p546_p0 }
   0x6   :  { %554 = shalt.err (!%p551_p2)  }
   0x7   :  { %s661_s8 = smov [#allocation3]  }
   0x8   :  { %13 = dma.hbm_to_smem %s819_s0, 16, %s661_s8, [#allocation2] }
   0x9   :  { %637 = dma.done.wait [#allocation2], 16 }
   0xa   :  { %638 = vsyncadd [#allocation2], 4294967280 }
   0xb   :  { %15 = sfence }
   0xc   :  { %16 = vsyncpa [#allocation5], 0 }
   0xd   :  { %17 = vsyncpa [#allocation8], 0 }
   0xe   :  { %18 = vsyncpa [#allocation6], 0  ;;  %s662_s11 = smov [#allocation4]   ;;  %s663_s13 = smov [#allocation7]  }
   0xf   :  { %s45_s12 = sshll.u32 %s662_s11, 4  ;;  %s57_s14 = sshll.u32 %s663_s13, 4  ;;  %s46_s12 = int_to_ptr.vmem [resolvable:$true] %s45_s12  ;;  %s58_s14 = int_to_ptr.vmem [resolvable:$true] %s57_s14 }
  0x10   :  { %s555_s17 = scalar_lea.hbm %s822_s3, 64 }
  0x11   :  { %p556_p3 = scmp.ne.s32.totalorder %s822_s3, %s555_s17  ;;  %p559_p4 = scmp.lt.u32.totalorder %s555_s17, %s822_s3 }
  0x13   :  { %p561_p5 = pnand %p559_p4, %p556_p3 }
  0x15   :  { %564 = shalt.err (!%p561_p5)
}
  0x16   :  { %s565_s21 = scalar_lea.vmem %s46_s12, 64  ;;  %p570_p7 = scmp.lt.s32.totalorder %s46_s12, %s46_s12 }
  0x17   :  { %p566_p6 = scmp.ne.s32.totalorder %s46_s12, %s565_s21  ;;  %p571_p8 = scmp.lt.s32.totalorder %s565_s21, %s565_s21 }
  0x19   :  { %p572_p9 = por %p571_p8, %p570_p7 }
  0x1b   :  { %p573_p10 = pnand %p572_p9, %p566_p6 }
  0x1d   :  { %576 = shalt.err (!%p573_p10)
}
  0x1e   :  { %48 = dma.hbm_to_vmem [thread:$0]  %s822_s3, 64, %s46_s12, [#allocation5]  }
  0x1f   :  { %s577_s26 = scalar_lea.hbm %s824_s5, 16 }
  0x20   :  { %p578_p11 = scmp.ne.s32.totalorder %s824_s5, %s577_s26  ;;  %p581_p12 = scmp.lt.u32.totalorder %s577_s26, %s824_s5 }
  0x22   :  { %p583_p13 = pnand %p581_p12, %p578_p11 }
  0x24   :  { %586 = shalt.err (!%p583_p13)
}
  0x25   :  { %s587_s8 = scalar_lea.vmem %s58_s14, 16  ;;  %s591_s9 = scalar_lea.vmem %s58_s14, 32 }
  0x26   :  { %p588_p0 = scmp.ne.s32.totalorder %s58_s14, %s587_s8  ;;  %p592_p1 = scmp.lt.s32.totalorder %s58_s14, %s58_s14 }
  0x27   :  { %p593_p2 = scmp.lt.s32.totalorder %s591_s9, %s587_s8 }
  0x29   :  { %p594_p3 = por %p593_p2, %p592_p1 }
  0x2b   :  { %p595_p4 = pnand %p594_p3, %p588_p0 }
  0x2d   :  { %598 = shalt.err (!%p595_p4)
}
  0x2e   :  { %60 = dma.hbm_to_vmem [thread:$0]  %s824_s5, 16, %s58_s14, [#allocation8]  }
  0x2f   :  { %639 = dma.done.wait [#allocation5], 64  }
  0x30   :  { %640 = vsyncadd [#allocation5], 4294967232 }
  0x31   :  { %641 = dma.done.wait [#allocation8], 16  }
  0x32   :  { %642 = vsyncadd [#allocation8], 4294967280  ;;  %vm116_vm0 = vcmask 1040384   ;;  %v664_v0 = vmov -inf   ;;  %v665_v1 = vmov 0.0   ;;  %vm117_vm1 = vcmask 1041408  }
  0x33   :  { %103 = vst [vmem:[#allocation9] sm:$0x3] %v664_v0  ;;  %465 = vmatprep.subr.bf16.mxu1 %v665_v1  ;;  %477 = vmatprep.subr.bf16.mxu0 %v665_v1  ;;  %v666_v2 = vmov 65535   ;;  %vm667_vm2 = vmmov 0   ;;  %vm168_vm3 = vcmask 1042432   ;;  %v108_v9 = vld [vmem:[%s821_s2] sm:$0xff]  ;;  %v333_v41 = vlaneseq }
  0x34   :  { %v118_v3 = vsel %vm116_vm0, 4294967295, %v666_v2  ;;  %467 = vmatprep.mubr.msk.bf16.mxu1 %vm667_vm2, %v665_v1  ;;  %493 = vmatprep.mubr.msk.bf16.mxu0 %vm667_vm2, %v665_v1  ;;  %v169_v4 = vsel %vm117_vm1, 4294967295, %v666_v2  ;;  %v107_v6 = vld [vmem:[#allocation4] sm:$0x7]  ;;  %v109_v11 = vld [vmem:[%s821_s2 + $0x8] sm:$0x3f] }
  0x35   :  { %v119_v5 = vsel %vm117_vm1, %v118_v3, 0  ;;  %v111_v7 = vld [vmem:[%s823_s4] sm:$0x3]  ;;  %v170_v8 = vsel %vm168_vm3, %v169_v4, 0  ;;  %v110_v12 = vpack.c.bf16 %v109_v11, %v108_v9  ;;  %vm112_vm4 = vcmask 23552   ;;  %v538_v15 = vld [vmem:[%s825_s6 + $0x8] sm:$0xff]  }
  0x36   :  { %v121_v10 = vand.u32 %v119_v5, %v111_v7  ;;  %v537_v13 = vld [vmem:[%s825_s6] sm:$0xff]   ;;  %v172_v14 = vand.u32 %v170_v8, %v107_v6  ;;  %v105_v17 = vld [vmem:[%s820_s1 + $0x8] sm:$0x3f]  ;;  %v539_v18 = vld [vmem:[%s825_s6 + $0x10] sm:$0xff]   ;;  %vm164_vm5 = vcmask 39936   ;;  %v787_v42 = vshrl.u32 %v333_v41, 7 }
  0x37   :  { %478 = vmatpush3.bf16.msra.mxu0 %v537_v13  ;;  %v104_v16 = vld [vmem:[%s820_s1] sm:$0xff]  ;;  %v540_v20 = vld [vmem:[%s825_s6 + $0x18] sm:$0xff]   ;;  %v542_v22 = vld [vmem:[%s825_s6 + $0x28] sm:$0xff]   ;;  %s649_s9 = smov 0   ;;  %s653_s3 = smov 0  }
  0x38   :  { %466 = vmatpush3.bf16.msra.mxu1 %v121_v10  ;;  %479 = vmatprep.subr.bf16.mxu0 %v665_v1  ;;  %v106_v19 = vpack.c.bf16 %v105_v17, %v104_v16  ;;  %v541_v21 = vld [vmem:[%s825_s6 + $0x20] sm:$0xff]   ;;  %v543_v23 = vld [vmem:[%s825_s6 + $0x30] sm:$0xff]   ;;  %v544_v24 = vld [vmem:[%s825_s6 + $0x38] sm:$0xff]   ;;  %v790_v43 = vadd.s32 8, %v787_v42  ;;  %s645_s6 = smov 0  }
  0x39   :  { %471 = vmatprep.subr.bf16.mxu1 %v665_v1  ;;  %v443_v30 = vld [vmem:[#allocation7] ss:$0 sm:$0xff] }
  0x3b   :  { %468 = vmatmul.mubr.msk.bf16.vlgmr.msra.gmra.mrb[0].mxu1 %vm112_vm4, %v110_v12  ;;  %480 = vmatpush3.bf16.msra.mxu0 %v538_v15 }
  0x3c   :  { %472 = vmatpush3.bf16.msra.mxu1 %v172_v14  ;;  %473 = vmatprep.mubr.msk.bf16.mxu1 %vm667_vm2, %v665_v1 }
  0x3d   :  { %481 = vmatprep.subr.bf16.mxu0 %v665_v1 }
  0x3f   :  { %482 = vmatpush3.bf16.msra.mxu0 %v539_v18 }
  0x40   :  { %483 = vmatprep.subr.bf16.mxu0 %v665_v1 }
  0x43   :  { %474 = vmatmul.mubr.msk.bf16.vlgmr.msra.gmra.mrb[4].mxu1 %vm164_vm5, %v106_v19  ;;  %484 = vmatpush3.bf16.msra.mxu0 %v540_v20 }
  0x44   :  { %485 = vmatprep.subr.bf16.mxu0 %v665_v1 }
  0x47   :  { %486 = vmatpush3.bf16.msra.mxu0 %v541_v21 }
  0x48   :  { %487 = vmatprep.subr.bf16.mxu0 %v665_v1 }
  0x4b   :  { %488 = vmatpush3.bf16.msra.mxu0 %v542_v22 }
  0x4c   :  { %489 = vmatprep.subr.bf16.mxu0 %v665_v1 }
  0x4f   :  { %490 = vmatpush3.bf16.msra.mxu0 %v543_v23 }
  0x50   :  { %491 = vmatprep.subr.bf16.mxu0 %v665_v1 }
  0x53   :  { %492 = vmatpush3.bf16.msra.mxu0 %v544_v24 }
 0x10e   :  { %v157_v25 = vpop.f32.mrb[0].mxu1 }
 0x10f   :  { %v469_v26 = vpop.f32.mrb[1].mxu1 }
 0x110   :  { %v160_v27 = vpop.f32.mrb[2].mxu1 }
 0x111   :  { %v470_v28 = vpop.f32.mrb[3].mxu1 }
 0x116   :  { %v208_v29 = vpop.f32.mrb[4].mxu1 }
 0x117   :  { %v209_v31 = vadd.f32 %v208_v29, %v157_v25  ;;  %v475_v32 = vpop.f32.mrb[5].mxu1 }
 0x118   :  { %v211_v33 = vpop.f32.mrb[6].mxu1 }
 0x119   :  { %v222_v34 = vadd.f32 %v443_v30, %v209_v31  ;;  %v212_v35 = vadd.f32 %v211_v33, %v160_v27  ;;  %v476_v36 = vpop.f32.mrb[7].mxu1 }
 0x11b   :  { %v223_v37 = vadd.f32 %v443_v30, %v212_v35  ;;  %v224_v38 = vmax.f32 %v222_v34, 0.0 }
 0x11d   :  { %v225_v39 = vmax.f32 %v223_v37, 0.0 }
 0x11f   :  { %v226_v40 = vpack.c.bf16 %v225_v39, %v224_v38 }
 0x121   :  { %494 = vmatmul.mubr.bf16.vlgmr.msra.gmra.mrb[0].mxu0 %v226_v40 }
 0x1f4   :  { %v325_v44 = vpop.f32.mrb[0].mxu0 }
 0x1f5   :  { %v495_v45 = vpop.f32.mrb[1].mxu0 }
 0x1f6   :  { %v328_v46 = vpop.f32.mrb[2].mxu0 }
 0x1f7   :  { %v496_v47 = vpop.f32.mrb[3].mxu0 }
 0x1f8 LB: > { %s347_s10 = sadd.s32 1, %s655_s3   ;;  %s352_s5 = sld [smem:[#allocation3 + %s655_s3]]  ;;  %s655_s3 = sphi %s653_s3, %s654_s3   ;;  %s651_s9 = sphi %s649_s9, %s650_s9   ;;  %s647_s6 = sphi %s645_s6, %s646_s6  }
 0x1f9   : > { %s348_s11 = sld [smem:[#allocation3 + %s347_s10]]  ;;  %p341_p7 = scmp.ge.s32.totalorder %s347_s10, 2  }
 0x1fa   : > { %s654_s3 = smov %s347_s10  }
 0x1fe   : > { %p354_p5 = scmp.lt.s32.totalorder %s352_s5, 14  ;;  %343 = sbr.rel (!%p341_p7) target bundleno = 504 (0x1f8), region = 76 }
 0x1ff   : > { %p349_p6 = scmp.le.s32.totalorder %s348_s11, 0 }
 0x200   : > { %s355_s12 = scalar_select %p354_p5, 1, 0 }
 0x201   : > { %s350_s13 = scalar_select %p349_p6, 1, 0 }
 0x202   : > { %s792_s6 = sadd.s32 %s647_s6, %s355_s12  }
 0x203   : > { %s827_s14 = smov %s792_s6  ;;  %s351_s15 = sadd.s32 %s651_s9, %s350_s13  }
 0x204   : > { %s646_s6 = smov %s827_s14   ;;  %s650_s9 = smov %s351_s15  }
 0x205   :  { %p437_p8 = scmp.ge.s32.totalorder %s351_s15, %s827_s14 }
 0x207   :  { %438 = sbr.rel (%p437_p8) target bundleno = 557 (0x22d), region = 81 }
 0x20e LB: > { %s363_s16 = sld [smem:[#allocation3 + %s659_s15]]  ;;  %s364_s17 = sadd.s32 1, %s659_s15   ;;  %vm380_vm11 = vcmask 1045504   ;;  %v390_v59 = vstv %s659_s15  ;;  %v389_v60 = vld [vmem:[#allocation9] sm:$0x3]  ;;  %s659_s15 = sphi %s351_s15, %s828_s15  }
 0x20f   : > { %s365_s4 = sld [smem:[#allocation3 + %s364_s17]]  ;;  %vm391_vm13 = vcmp.eq.s32.totalorder %v787_v42, %v390_v59  ;;  %p359_p9 = scmp.ge.s32.totalorder %s364_s17, %s827_s14 }
 0x210   : > { %s828_s15 = smov %s364_s17 }
 0x214   : > { %v366_v48 = vstv %s363_s16 }
 0x215   : > { %vm367_vm6 = vcmp.ge.s32.totalorder %v787_v42, %v366_v48  ;;  %vm368_vm7 = vcmp.ge.s32.totalorder %v790_v43, %v366_v48  ;;  %v369_v49 = vstv %s365_s4 }
 0x216   : > { %vm370_vm8 = vcmp.lt.s32.totalorder %v787_v42, %v369_v49  ;;  %vm371_vm9 = vcmp.lt.s32.totalorder %v790_v43, %v369_v49 }
 0x217   : > { %vm372_vm10 = vmand %vm367_vm6, %vm370_vm8 }
 0x218   : > { %vm373_vm12 = vmand %vm368_vm7, %vm371_vm9  ;;  %v378_v50 = vsel %vm372_vm10, %v325_v44, -inf }
 0x219   : > { %v379_v51 = vsel %vm373_vm12, %v328_v46, -inf }
 0x21a   : > { %v381_v52 = vsel %vm380_vm11, %v379_v51, -inf }
 0x21b   : > { %v382_v53 = vmax.f32 %v378_v50, %v381_v52 }
 0x21d   : > { %v383_v54 = vrot.slane %v382_v53, 4 }
 0x21f   : > { %v384_v55 = vmax.f32 %v382_v53, %v383_v54 }
 0x221   : > { %v385_v56 = vrot.slane %v384_v55, 2 }
 0x223   : > { %v386_v57 = vmax.f32 %v384_v55, %v385_v56 }
 0x225   : > { %v387_v58 = vrot.slane %v386_v57, 1 }
 0x226   :  { %362 = sbr.rel (!%p359_p9) target bundleno = 526 (0x20e), region = 87 }
 0x227   : > { %v388_v61 = vmax.f32 %v386_v57, %v387_v58 }
 0x229   : > { %v392_v62 = vmax.f32 %v389_v60, %v388_v61 }
 0x22b   : > { %v395_v63 = vsel %vm391_vm13, %v392_v62, %v389_v60 }
 0x22c   : > { %396 = vst [vmem:[#allocation9] sm:$0x3] %v395_v63 }
 0x22d PF:  { %s668_s18 = smov [#allocation9]  }
 0x22e   :  { %s403_s19 = sshll.u32 %s668_s18, 4  ;;  %s404_s19 = int_to_ptr.vmem [resolvable:$true] %s403_s19 }
 0x22f   :  { %s599_s0 = scalar_lea.vmem %s404_s19, 32  ;;  %p604_p11 = scmp.lt.s32.totalorder %s404_s19, %s404_s19 }
 0x230   :  { %p600_p10 = scmp.ne.s32.totalorder %s404_s19, %s599_s0  ;;  %p605_p12 = scmp.lt.s32.totalorder %s599_s0, %s599_s0 }
 0x232   :  { %p606_p13 = por %p605_p12, %p604_p11 }
 0x234   :  { %p607_p0 = pnand %p606_p13, %p600_p10 }
 0x236   :  { %610 = shalt.err (!%p607_p0)
}
 0x237   :  { %s611_s21 = scalar_lea.hbm %s826_s7, 32 }
 0x238   :  { %p612_p1 = scmp.ne.s32.totalorder %s826_s7, %s611_s21  ;;  %p615_p2 = scmp.lt.u32.totalorder %s611_s21, %s826_s7 }
 0x23a   :  { %p617_p3 = pnand %p615_p2, %p612_p1 }
 0x23c   :  { %620 = shalt.err (!%p617_p3)
}
 0x23d   :  { %406 = dma.vmem_to_hbm [thread:$0]  %s404_s19, 32, %s826_s7, [#allocation6]  }
 0x23e   :  { %643 = dma.done.wait [#allocation6], 32  }
 0x23f   :  { %644 = vsyncadd [#allocation6], 4294967264 }
 0x240   :  { %410 = vsyncpa [#allocation5], 1 }
 0x241   :  { %411 = vsyncpa [#allocation8], 1 }
 0x242   :  { %412 = vsyncpa [#allocation6], 1 }

</bundles_post_ra>
